<compile_context>
chip_gen: v5e
topology: v5e:2x2
jax: 0.10.0
libtpu: 0.0.40
codegen_flags: <defaults>
</compile_context>

<pallas_src>
import jax
import jax.numpy as jnp
from jax.experimental import pallas as pl
from jax.experimental.pallas import tpu as pltpu

EPS = 1e-6


def _make_kernel(n_total, tn, static_p, eps):
    """Build the GeM kernel body for a fixed sequence tiling / p handling."""

    def kernel(p_ref, x_ref, o_ref, acc_ref):
        # p_ref:   SMEM (1,) learnable exponent (unused on the static-p path)
        # x_ref:   VMEM (TB, TN, TC) input tile
        # o_ref:   VMEM (TB, TC) output tile
        # acc_ref: VMEM (TB, TC) f32 running sum over the sequence axis
        kn = pl.program_id(2)

        @pl.when(kn == 0)
        def _init():
            acc_ref[...] = jnp.zeros_like(acc_ref)

        x = x_ref[...].astype(jnp.float32)                      # (TB, TN, TC)
        # Mask rows of the (possibly padded) last sequence tile.
        row = jax.lax.broadcasted_iota(jnp.int32, x.shape, 1) + kn * tn
        valid = row < n_total
        xc = jnp.maximum(jnp.where(valid, x, eps), eps)          # clamp(min=eps)

        if static_p is not None:
            # Integer-p fast path: pure VPU multiplies, no EUP transcendentals.
            xp = xc
            for _ in range(static_p - 1):
                xp = xp * xc
        else:
            p = p_ref[0]
            # xc > 0 after the clamp, so log is safe.
            xp = jnp.exp(p * jnp.log(xc))

        xp = jnp.where(valid, xp, 0.0)
        acc_ref[...] += jnp.sum(xp, axis=1)                      # (TB, TC)

        @pl.when(kn == pl.num_programs(2) - 1)
        def _finalize():
            m = acc_ref[...] * jnp.float32(1.0 / n_total)        # mean over n
            if static_p is not None:
                inv_p = jnp.float32(1.0 / static_p)
            else:
                inv_p = 1.0 / p_ref[0]
            o_ref[...] = jnp.exp(jnp.log(m) * inv_p).astype(o_ref.dtype)

    return kernel


def _pick_tiles(b, n, c, itemsize):
    """Choose (TB, TC, TN) so double-buffered tiles fit every chip's scoped VMEM."""
    # Channel (lane) tile: keep full c when modest, otherwise a multiple of 128.
    tc = c if c <= 512 else 512
    # Batch tile: up to a full sublane group so the output store is denser.
    tb = b if b <= 8 else 8
    # Sequence (reduction) tile: ~2 MiB per input buffer keeps
    # 2 x input + accumulator far under the 16 MiB scoped default (v5e).
    sub = max(8, 32 // itemsize)            # 8 for f32, 16 for bf16/f16
    budget = 2 * 1024 * 1024                # bytes per input buffer
    tn = budget // max(1, tb * tc * itemsize)
    tn = max(sub, (tn // sub) * sub)
    if tn >= n:
        tn = n                              # full axis is always a legal block
    return tb, tc, tn


def gem_att(x, p, *, eps=EPS):
    """x: (b, n, c) float array; p: learnable exponent (shape-(1,) array or scalar).

    Returns (b, c) in x's dtype (f32 accumulation inside the kernel)."""
    b, n, c = x.shape
    out_dtype = x.dtype
    itemsize = jnp.dtype(x.dtype).itemsize

    # Static integer-p fast path when p is concrete (not traced) and small.
    static_p = None
    try:
        p_val = float(jnp.asarray(p).reshape(()))
        if p_val == round(p_val) and 1 <= int(round(p_val)) <= 8:
            static_p = int(round(p_val))
    except (jax.errors.ConcretizationTypeError,
            jax.errors.TracerArrayConversionError, TypeError):
        static_p = None

    p_arr = jnp.asarray(p, dtype=jnp.float32).reshape((1,))

    tb, tc, tn = _pick_tiles(b, n, c, itemsize)
    grid = (pl.cdiv(b, tb), pl.cdiv(c, tc), pl.cdiv(n, tn))

    kernel = _make_kernel(n, tn, static_p, float(eps))

    cost = pl.CostEstimate(
        flops=3 * b * n * c,
        transcendentals=0 if static_p is not None else 2 * b * n * c,
        bytes_accessed=b * n * c * itemsize + b * c * jnp.dtype(out_dtype).itemsize,
    )

    return pl.pallas_call(
        kernel,
        out_shape=jax.ShapeDtypeStruct((b, c), out_dtype),
        grid=grid,
        in_specs=[
            pl.BlockSpec(memory_space=pltpu.MemorySpace.SMEM),              # p
            pl.BlockSpec((tb, tn, tc), lambda ib, jc, kn: (ib, kn, jc)),    # x
        ],
        out_specs=pl.BlockSpec((tb, tc), lambda ib, jc, kn: (ib, jc)),
        scratch_shapes=[pltpu.VMEM((tb, tc), jnp.float32)],
        compiler_params=pltpu.CompilerParams(
            dimension_semantics=("parallel", "parallel", "arbitrary")),
        cost_estimate=cost,
    )(p_arr, x)


def gem_att_ref(x, p, eps=EPS):
    """Pure-JAX reference mirroring the PyTorch forward."""
    xc = jnp.maximum(x.astype(jnp.float32), eps)
    m = jnp.mean(xc ** p, axis=1)
    return (m ** (1.0 / p)).astype(x.dtype)


if __name__ == "__main__":
    key = jax.random.PRNGKey(0)
    b, n, c = 2, 8, 32
    x = jax.random.normal(key, (b, n, c), dtype=jnp.float32)

    # Deterministic parameter init, matching nn.Parameter(torch.ones(1) * 3).
    p_param = jnp.ones((1,), dtype=jnp.float32) * 3.0

    # 1) Static integer-p fast path (p=3 -> x*x*x on the VPU).
    out = jax.block_until_ready(gem_att(x, p_param))
    ref = gem_att_ref(x, 3.0)
    assert out.shape == (b, c), out.shape
    assert jnp.allclose(out, ref, rtol=1e-4, atol=1e-5), (out, ref)

    # 2) Dynamic (non-integer) p exercises the exp/log path.
    p_dyn = jnp.asarray([2.5], dtype=jnp.float32)
    out_dyn = jax.block_until_ready(gem_att(x, p_dyn))
    ref_dyn = gem_att_ref(x, 2.5)
    assert jnp.allclose(out_dyn, ref_dyn, rtol=1e-4, atol=1e-5), (out_dyn, ref_dyn)

    # 3) Under jit the parameter is a tracer -> learnable-p path is taken.
    out_jit = jax.block_until_ready(jax.jit(gem_att)(x, p_param))
    assert jnp.allclose(out_jit, ref, rtol=1e-4, atol=1e-5), (out_jit, ref)

    print("KERNEL_OK")
</pallas_src>

<mosaic_0001>
module attributes {stable_mosaic.version = 11 : i64} {
  func.func @kernel(%arg0: i32, %arg1: i32, %arg2: i32, %arg3: memref<1xf32, #tpu.memory_space<smem>>, %arg4: memref<2x8x32xf32, #tpu.memory_space<vmem>>, %arg5: memref<2x32xf32, #tpu.memory_space<vmem>>, %arg6: memref<2x32xf32, #tpu.memory_space<vmem>>) attributes {dimension_semantics = [#tpu.dimension_semantics<parallel>, #tpu.dimension_semantics<parallel>, #tpu.dimension_semantics<arbitrary>], iteration_bounds = array<i64: 1, 1, 1>, scalar_prefetch = 0 : i64, scratch_operands = 1 : i64, tpu.core_type = #tpu.core_type<tc>, window_params = [{transform_indices = @transform_0, window_bounds = array<i64: 1>}, {transform_indices = @transform_1, window_bounds = array<i64: 2, 8, 32>}, {transform_indices = @transform_2, window_bounds = array<i64: 2, 32>}]} {
    %c0_i32 = arith.constant 0 : i32
    %0 = arith.cmpi eq, %arg2, %c0_i32 : i32
    %1 = arith.extui %0 : i1 to i32
    %c0_i32_0 = arith.constant 0 : i32
    %2 = arith.cmpi ne, %1, %c0_i32_0 : i32
    scf.if %2 {
      %cst_13 = arith.constant 0.000000e+00 : f32
      %25 = vector.broadcast %cst_13 : f32 to vector<2x32xf32>
      %c0_14 = arith.constant 0 : index
      %c0_15 = arith.constant 0 : index
      %26 = vector.load %arg6[%c0_14, %c0_15] : memref<2x32xf32, #tpu.memory_space<vmem>>, vector<2x32xf32>
      tpu.vector_store %arg6[%c0_14, %c0_15], %25 {strides = array<i32>} : memref<2x32xf32, #tpu.memory_space<vmem>>, vector<2x32xf32>,
    } else {
    }
    %c0 = arith.constant 0 : index
    %c0_1 = arith.constant 0 : index
    %c0_2 = arith.constant 0 : index
    %3 = vector.load %arg4[%c0, %c0_1, %c0_2] : memref<2x8x32xf32, #tpu.memory_space<vmem>>, vector<2x8x32xf32>
    %4 = tpu.iota {dimensions = array<i32: 1>} : vector<2x8x32xi32>
    %c8_i32 = arith.constant 8 : i32
    %5 = arith.muli %arg2, %c8_i32 : i32
    %6 = vector.broadcast %5 : i32 to vector<2x8x32xi32>
    %7 = arith.addi %4, %6 : vector<2x8x32xi32>
    %c8_i32_3 = arith.constant 8 : i32
    %8 = vector.broadcast %c8_i32_3 : i32 to vector<2x8x32xi32>
    %9 = arith.cmpi slt, %7, %8 : vector<2x8x32xi32>
    %cst = arith.constant 9.99999997E-7 : f32
    %10 = vector.broadcast %cst : f32 to vector<2x8x32xf32>
    %11 = arith.select %9, %3, %10 : vector<2x8x32xi1>, vector<2x8x32xf32>
    %cst_4 = arith.constant 9.99999997E-7 : f32
    %12 = vector.broadcast %cst_4 : f32 to vector<2x8x32xf32>
    %13 = arith.maximumf %11, %12 : vector<2x8x32xf32>
    %14 = arith.mulf %13, %13 : vector<2x8x32xf32>
    %15 = arith.mulf %14, %13 : vector<2x8x32xf32>
    %cst_5 = arith.constant 0.000000e+00 : f32
    %16 = vector.broadcast %cst_5 : f32 to vector<2x8x32xf32>
    %17 = arith.select %9, %15, %16 : vector<2x8x32xi1>, vector<2x8x32xf32>
    %c0_6 = arith.constant 0 : index
    %c0_7 = arith.constant 0 : index
    %18 = vector.load %arg6[%c0_6, %c0_7] : memref<2x32xf32, #tpu.memory_space<vmem>>, vector<2x32xf32>
    %cst_8 = arith.constant dense<0.000000e+00> : vector<2x32xf32>
    %19 = vector.multi_reduction <add>, %17, %cst_8 [1] : vector<2x8x32xf32> to vector<2x32xf32>
    %20 = arith.addf %18, %19 : vector<2x32xf32>
    %c0_9 = arith.constant 0 : index
    %c0_10 = arith.constant 0 : index
    %21 = vector.load %arg6[%c0_9, %c0_10] : memref<2x32xf32, #tpu.memory_space<vmem>>, vector<2x32xf32>
    tpu.vector_store %arg6[%c0_9, %c0_10], %20 {strides = array<i32>} : memref<2x32xf32, #tpu.memory_space<vmem>>, vector<2x32xf32>,
    %c0_i32_11 = arith.constant 0 : i32
    %22 = arith.cmpi eq, %arg2, %c0_i32_11 : i32
    %23 = arith.extui %22 : i1 to i32
    %c0_i32_12 = arith.constant 0 : i32
    %24 = arith.cmpi ne, %23, %c0_i32_12 : i32
    scf.if %24 {
      %c0_13 = arith.constant 0 : index
      %c0_14 = arith.constant 0 : index
      %25 = vector.load %arg6[%c0_13, %c0_14] : memref<2x32xf32, #tpu.memory_space<vmem>>, vector<2x32xf32>
      %cst_15 = arith.constant 1.250000e-01 : f32
      %26 = vector.broadcast %cst_15 : f32 to vector<2x32xf32>
      %27 = arith.mulf %25, %26 : vector<2x32xf32>
      %28 = math.log %27 : vector<2x32xf32>
      %cst_16 = arith.constant 0.333333343 : f32
      %29 = vector.broadcast %cst_16 : f32 to vector<2x32xf32>
      %30 = arith.mulf %28, %29 : vector<2x32xf32>
      %31 = math.exp %30 : vector<2x32xf32>
      %c0_17 = arith.constant 0 : index
      %c0_18 = arith.constant 0 : index
      %32 = vector.load %arg5[%c0_17, %c0_18] : memref<2x32xf32, #tpu.memory_space<vmem>>, vector<2x32xf32>
      tpu.vector_store %arg5[%c0_17, %c0_18], %31 {strides = array<i32>} : memref<2x32xf32, #tpu.memory_space<vmem>>, vector<2x32xf32>,
    } else {
    }
    return
  }
  func.func @transform_0(%arg0: i32, %arg1: i32, %arg2: i32) -> i32 {
    %c0_i32 = arith.constant 0 : i32
    %c0_i32_0 = arith.constant 0 : i32
    return %c0_i32 : i32
  }
  func.func @transform_1(%arg0: i32, %arg1: i32, %arg2: i32) -> (i32, i32, i32) {
    %c0_i32 = arith.constant 0 : i32
    return %arg0, %arg2, %arg1 : i32, i32, i32
  }
  func.func @transform_2(%arg0: i32, %arg1: i32, %arg2: i32) -> (i32, i32) {
    %c0_i32 = arith.constant 0 : i32
    return %arg0, %arg1 : i32, i32
  }
}

</mosaic_0001>

<bundles_post_ra>
// kernel: tpu_custom_call.1
= control target key start
LH: loop header
LB: loop body
LE: loop exit
PB: predicated region body
PF: predicated region fallthrough
CT: control target
= control target key end

     0   :  { %8 = vsyncpa [#allocation5], 0  ;;  %s195_s0 = inlined_call_operand.<no memory space> [shape: f32[1], index: 0, kind: input, shape index: {}]   ;;  %s196_s1 = inlined_call_operand.hbm [shape: f32[2,8,32], index: 1, kind: input, shape index: {}]   ;;  %s197_s2 = inlined_call_operand.hbm [shape: f32[2,32], index: 2, kind: output, shape index: {}]  }
   0x1   :  { %9 = vsyncpa [#allocation6], 0  ;;  %s16_s11 = sshll.u32 %s196_s1, 4  ;;  %s166_s12 = smov [#allocation4]   ;;  %s17_s11 = int_to_ptr.hbm [resolvable:$true] %s16_s11 }
   0x2   :  { %s18_s13 = sshll.u32 %s166_s12, 4  ;;  %s167_s14 = smov 128   ;;  %s19_s13 = int_to_ptr.vmem [resolvable:$true] %s18_s13 }
   0x3   :  { %s168_s15 = smov 8  }
   0x4   :  { %24 = dma.hbm_to_vmem [thread:$0]  %s17_s11, 256, %s19_s13, [#allocation5], %s167_s14, %s167_s14, %s168_s15  }
   0x5   :  { %162 = dma.done.wait [#allocation5], 256  }
   0x6   :  { %163 = vsyncadd [#allocation5], 4294967040  ;;  %vm33_vm0 = vcmask 254976   ;;  %v169_v0 = vmov 0.0   ;;  %v35_v1 = vld [vmem:[#allocation4] sm:$0xff]  ;;  %v36_v2 = vld [vmem:[#allocation4 + $0x8] sm:$0xff] }
   0x7   :  { %34 = vst.msk [vmem:[#allocation2] sm:$0x3] %vm33_vm0, %v169_v0  ;;  %v45_v3 = vmax.f32 %v35_v1, 1e-06  ;;  %v46_v4 = vmax.f32 %v36_v2, 1e-06 }
   0x8   :  { %vm54_vm1 = vcmask 261120   ;;  %vm71_vm2 = vcmask 1041409   ;;  %s170_s0 = smov [#allocation7]   ;;  %s95_s18 = sshll.u32 %s197_s2, 4  ;;  %s96_s18 = int_to_ptr.hbm [resolvable:$true] %s95_s18 }
   0x9   :  { %v47_v5 = vmul.f32 %v45_v3, %v45_v3  ;;  %v48_v6 = vmul.f32 %v46_v4, %v46_v4  ;;  %s93_s1 = sshll.u32 %s170_s0, 4  ;;  %s94_s1 = int_to_ptr.vmem [resolvable:$true] %s93_s1 }
   0xb   :  { %v49_v7 = vmul.f32 %v47_v5, %v45_v3  ;;  %v50_v8 = vmul.f32 %v48_v6, %v46_v4 }
   0xd   :  { %v55_v9 = vsel %vm54_vm1, %v49_v7, 0.0  ;;  %v62_v10 = vsel %vm54_vm1, %v50_v8, 0.0 }
   0xe   :  { %v56_v11 = vrot.slane %v55_v9, 4  ;;  %v63_v12 = vrot.slane %v62_v10, 4  ;;  %v53_v21 = vld [vmem:[#allocation2] sm:$0x3] }
  0x10   :  { %v57_v13 = vadd.f32 %v56_v11, %v55_v9  ;;  %v64_v14 = vadd.f32 %v63_v12, %v62_v10 }
  0x12   :  { %v58_v15 = vrot.slane %v57_v13, 2  ;;  %v65_v16 = vrot.slane %v64_v14, 2 }
  0x14   :  { %v59_v17 = vadd.f32 %v58_v15, %v57_v13  ;;  %v66_v18 = vadd.f32 %v65_v16, %v64_v14 }
  0x16   :  { %v60_v19 = vrot.slane %v59_v17, 1  ;;  %v67_v20 = vrot.slane %v66_v18, 1 }
  0x18   :  { %v61_v22 = vadd.f32 %v60_v19, %v59_v17  ;;  %v68_v23 = vadd.f32 %v67_v20, %v66_v18 }
  0x1a   :  { %v72_v24 = vsel %vm71_vm2, %v68_v23, %v61_v22 }
  0x1b   :  { %v74_v25 = vadd.f32 %v72_v24, %v53_v21 }
  0x1d   :  { %76 = vst.msk [vmem:[#allocation2] sm:$0x3] %vm33_vm0, %v74_v25 }
  0x24   :  { %v80_v26 = vld [vmem:[#allocation2] sm:$0x3] }
  0x25   :  { %v81_v27 = vmul.f32 0.125, %v80_v26 }
  0x27   :  { %110 = vlog2.f32 %v81_v27 }
  0x2d   :  { %v111_v28 = vpop.eup %110 }
  0x2e   :  { %v83_v29 = vmul.f32 0.6931472, %v111_v28 }
  0x30   :  { %v84_v30 = vmul.f32 0.33333334, %v83_v29 }
  0x32   :  { %v85_v31 = vmul.f32 1.442695, %v84_v30 }
  0x34   :  { %112 = vpow2.f32 %v85_v31 }
  0x3a   :  { %v113_v32 = vpop.eup %112 }
  0x3b   :  { %87 = vst.msk [vmem:[#allocation7] sm:$0x3] %vm33_vm0, %v113_v32 }
  0x3c   :  { %98 = dma.vmem_to_hbm [thread:$0]  %s94_s1, 32, %s96_s18, [#allocation6]  }
  0x3d   :  { %164 = dma.done.wait [#allocation6], 32  }
  0x3e   :  { %165 = vsyncadd [#allocation6], 4294967264 }
  0x3f   :  { %103 = vsyncpa [#allocation5], 1 }
  0x40   :  { %104 = vsyncpa [#allocation6], 1 }

</bundles_post_ra>
